<compile_context>
chip_gen: v5e
topology: v5e:2x2
jax: 0.10.0
libtpu: 0.0.40
codegen_flags: <defaults>
</compile_context>

<pallas_src>
import functools

import jax
import jax.numpy as jnp
from jax import lax
from jax.experimental import pallas as pl
from jax.experimental.pallas import tpu as pltpu


# ----------------------------------------------------------------------------
# Fused kernel: the entire MLP for one batch tile.
# ----------------------------------------------------------------------------
def _mlp_fused_kernel(x_ref, *refs, num_linear, act, has_norm, compute_dtype):
    o_ref = refs[-1]
    wbs = refs[:-1]  # interleaved (w, b) per linear layer; w is (in, out), b is (1, out)

    def mxu_dot(a_f32, w_loaded):
        if compute_dtype is not None:
            a = a_f32.astype(compute_dtype)
            w = w_loaded.astype(compute_dtype)
        else:
            a = a_f32
            w = w_loaded.astype(jnp.float32)
        return jnp.dot(a, w, preferred_element_type=jnp.float32)

    h = x_ref[...].astype(jnp.float32)

    for layer in range(num_linear):  # static unroll (depth is a Python int)
        w_ref = wbs[2 * layer]
        b = wbs[2 * layer + 1][...].astype(jnp.float32)  # (1, out)

        if layer == 0:
            # First layer of nn.Sequential: plain Linear.
            h = mxu_dot(h, w_ref[...]) + b
        else:
            if has_norm:
                # nn.LayerNorm(width, elementwise_affine=False), eps = 1e-5
                mu = jnp.mean(h, axis=-1, keepdims=True)
                var = jnp.mean((h - mu) * (h - mu), axis=-1, keepdims=True)
                h = (h - mu) * lax.rsqrt(var + 1e-5)
            if act == "crelu":
                # CReLU without the lane-axis concat: split the weight instead.
                half = w_ref.shape[0] // 2
                w = w_ref[...]
                y = mxu_dot(jnp.maximum(h, 0.0), w[:half])
                y = y + mxu_dot(jnp.maximum(-h, 0.0), w[half:])
                h = y + b
            else:  # "relu"
                h = mxu_dot(jnp.maximum(h, 0.0), w_ref[...]) + b

    o_ref[...] = h.astype(o_ref.dtype)


# ----------------------------------------------------------------------------
# Wrapper: one pallas_call for the whole MLP, batch-tiled grid.
# ----------------------------------------------------------------------------
def mlp_forward(params, x, *, act="relu", has_norm=False, compute_dtype=None,
                block_m=256):
    """Mirrors MLP.forward: Linear, then (depth-1) x ([LN], act, Linear).

    params: list of (w, b) with w pre-transposed to (in, out) and b of shape (1, out).
    """
    if act not in ("relu", "crelu"):
        raise NotImplementedError(f"{act} is not implemented.")
    batch, dim_in = x.shape
    dim_out = int(params[-1][0].shape[1])
    num_linear = len(params)

    # Batch tile: whole batch if small, else 256-row tiles (multiple of 8/128).
    tm = batch if batch <= block_m else block_m
    grid = (pl.cdiv(batch, tm),)

    in_specs = [pl.BlockSpec((tm, dim_in), lambda i: (i, 0))]
    flat_params = []
    for w, b in params:
        # Full-array blocks with constant index_map -> DMA'd once, VMEM-resident.
        in_specs.append(pl.BlockSpec(w.shape, lambda i: (0, 0)))
        in_specs.append(pl.BlockSpec(b.shape, lambda i: (0, 0)))
        flat_params.extend((w, b))
    out_specs = pl.BlockSpec((tm, dim_out), lambda i: (i, 0))

    kernel = functools.partial(
        _mlp_fused_kernel,
        num_linear=num_linear,
        act=act,
        has_norm=has_norm,
        compute_dtype=compute_dtype,
    )

    # VMEM budget: resident params + double-buffered x/out tiles + live f32 activations.
    param_bytes = sum(int(w.size) * w.dtype.itemsize + int(b.size) * b.dtype.itemsize
                      for w, b in params)
    max_feat = max([dim_in, dim_out] + [int(w.shape[1]) for w, _ in params])
    act_bytes = 6 * tm * max_feat * 4
    io_bytes = 2 * 2 * tm * (dim_in + dim_out) * x.dtype.itemsize
    vmem_limit = int(min(100 * (1 << 20),
                         max(16 * (1 << 20), 2 * param_bytes + act_bytes + io_bytes)))
    # TODO(synk): for very wide layers (a single weight > ~32 MiB, v7x's budget),
    # add K/N tiling of the weight matmuls instead of keeping weights fully resident.

    return pl.pallas_call(
        kernel,
        out_shape=jax.ShapeDtypeStruct((batch, dim_out), x.dtype),
        grid=grid,
        in_specs=in_specs,
        out_specs=out_specs,
        compiler_params=pltpu.CompilerParams(
            dimension_semantics=("parallel",),   # shard batch tiles across v7x's 2 TCs
            vmem_limit_bytes=vmem_limit,
        ),
    )(x, *flat_params)


# ----------------------------------------------------------------------------
# Parameter construction (PyTorch nn.Linear default init, stored as (in, out)).
# ----------------------------------------------------------------------------
def _init_linear(key, fan_in, fan_out, dtype=jnp.float32):
    kw, kb = jax.random.split(key)
    bound = 1.0 / float(fan_in) ** 0.5
    w = jax.random.uniform(kw, (fan_in, fan_out), dtype, -bound, bound)  # pre-transposed
    b = jax.random.uniform(kb, (1, fan_out), dtype, -bound, bound)
    return w, b


def make_mlp_params(key, dim_in, dim_out, depth, width, act="relu", dtype=jnp.float32):
    assert depth > 0, "Need at least one layer"
    if act == "crelu":
        width_multiplier = 2
    elif act == "relu":
        width_multiplier = 1
    else:
        raise NotImplementedError(f"{act} is not implemented.")
    effective_width = width * width_multiplier
    params = []
    if depth == 1:
        key, sub = jax.random.split(key)
        params.append(_init_linear(sub, dim_in, dim_out, dtype))
    else:
        key, sub = jax.random.split(key)
        params.append(_init_linear(sub, dim_in, width, dtype))
        for i in range(depth - 1):
            key, sub = jax.random.split(key)
            if i == depth - 2:
                params.append(_init_linear(sub, effective_width, dim_out, dtype))
            else:
                params.append(_init_linear(sub, effective_width, width, dtype))
    return params


# ----------------------------------------------------------------------------
# Pure-JAX reference (silent sanity check).
# ----------------------------------------------------------------------------
def mlp_forward_ref(params, x, *, act="relu", has_norm=False):
    w0, b0 = params[0]
    h = jnp.dot(x.astype(jnp.float32), w0, preferred_element_type=jnp.float32) + b0
    for w, b in params[1:]:
        if has_norm:
            mu = jnp.mean(h, axis=-1, keepdims=True)
            var = jnp.mean((h - mu) ** 2, axis=-1, keepdims=True)
            h = (h - mu) * lax.rsqrt(var + 1e-5)
        if act == "crelu":
            h = jnp.concatenate([jnp.maximum(h, 0.0), jnp.maximum(-h, 0.0)], axis=-1)
        else:
            h = jnp.maximum(h, 0.0)
        h = jnp.dot(h, w, preferred_element_type=jnp.float32) + b
    return h.astype(x.dtype)


if __name__ == "__main__":
    key = jax.random.PRNGKey(0)

    def run_case(k, batch, dim_in, dim_out, depth, width, act, has_norm,
                 compute_dtype=None, atol=1e-4, rtol=1e-4):
        kx, kp = jax.random.split(k)
        x = jax.random.normal(kx, (batch, dim_in), jnp.float32)
        params = make_mlp_params(kp, dim_in, dim_out, depth, width, act=act)
        out = mlp_forward(params, x, act=act, has_norm=has_norm,
                          compute_dtype=compute_dtype)
        out = jax.block_until_ready(out)
        ref = mlp_forward_ref(params, x, act=act, has_norm=has_norm)
        assert out.shape == (batch, dim_out), out.shape
        assert jnp.allclose(out, ref, atol=atol, rtol=rtol), \
            float(jnp.max(jnp.abs(out - ref)))

    k1, k2, k3, k4 = jax.random.split(key, 4)
    # Small shapes consistent with the module: x is (batch, dim_in).
    run_case(k1, batch=2, dim_in=16, dim_out=8, depth=3, width=32,
             act="relu", has_norm=False)
    run_case(k2, batch=16, dim_in=16, dim_out=8, depth=3, width=32,
             act="crelu", has_norm=True)
    run_case(k3, batch=2, dim_in=16, dim_out=8, depth=1, width=32,
             act="relu", has_norm=False)
    # Exercise the batch grid (2 tiles, one partial) at a slightly larger batch.
    run_case(k4, batch=384, dim_in=16, dim_out=8, depth=2, width=64,
             act="relu", has_norm=False)
    # bf16 MXU operands with f32 accumulation (v5e/v6e/v7x fast path), loose check.
    run_case(k1, batch=16, dim_in=16, dim_out=8, depth=3, width=32,
             act="relu", has_norm=False, compute_dtype=jnp.bfloat16,
             atol=5e-2, rtol=5e-2)

    print("KERNEL_OK")
</pallas_src>

<mosaic_0001>
module attributes {stable_mosaic.version = 11 : i64} {
  func.func @_mlp_fused_kernel(%arg0: i32, %arg1: memref<2x16xf32, #tpu.memory_space<vmem>>, %arg2: memref<16x32xf32, #tpu.memory_space<vmem>>, %arg3: memref<1x32xf32, #tpu.memory_space<vmem>>, %arg4: memref<32x32xf32, #tpu.memory_space<vmem>>, %arg5: memref<1x32xf32, #tpu.memory_space<vmem>>, %arg6: memref<32x8xf32, #tpu.memory_space<vmem>>, %arg7: memref<1x8xf32, #tpu.memory_space<vmem>>, %arg8: memref<2x8xf32, #tpu.memory_space<vmem>>) attributes {dimension_semantics = [#tpu.dimension_semantics<parallel>], iteration_bounds = array<i64: 1>, scalar_prefetch = 0 : i64, scratch_operands = 0 : i64, tpu.core_type = #tpu.core_type<tc>, window_params = [{transform_indices = @transform_0, window_bounds = array<i64: 2, 16>}, {pipeline_mode = #tpu.pipeline_mode<synchronous>, transform_indices = @transform_1, window_bounds = array<i64: 16, 32>}, {pipeline_mode = #tpu.pipeline_mode<synchronous>, transform_indices = @transform_2, window_bounds = array<i64: 1, 32>}, {pipeline_mode = #tpu.pipeline_mode<synchronous>, transform_indices = @transform_3, window_bounds = array<i64: 32, 32>}, {pipeline_mode = #tpu.pipeline_mode<synchronous>, transform_indices = @transform_4, window_bounds = array<i64: 1, 32>}, {pipeline_mode = #tpu.pipeline_mode<synchronous>, transform_indices = @transform_5, window_bounds = array<i64: 32, 8>}, {pipeline_mode = #tpu.pipeline_mode<synchronous>, transform_indices = @transform_6, window_bounds = array<i64: 1, 8>}, {transform_indices = @transform_7, window_bounds = array<i64: 2, 8>}]} {
    %c0 = arith.constant 0 : index
    %c0_0 = arith.constant 0 : index
    %0 = vector.load %arg1[%c0, %c0_0] : memref<2x16xf32, #tpu.memory_space<vmem>>, vector<2x16xf32>
    %c0_1 = arith.constant 0 : index
    %c0_2 = arith.constant 0 : index
    %1 = vector.load %arg3[%c0_1, %c0_2] : memref<1x32xf32, #tpu.memory_space<vmem>>, vector<1x32xf32>
    %c0_3 = arith.constant 0 : index
    %c0_4 = arith.constant 0 : index
    %2 = vector.load %arg2[%c0_3, %c0_4] : memref<16x32xf32, #tpu.memory_space<vmem>>, vector<16x32xf32>
    %cst = arith.constant dense<0.000000e+00> : vector<2x32xf32>
    %3 = tpu.matmul %0, %2, %cst {dimension_numbers = #tpu.dot_dimension_numbers<[1], [0], [0], [1], [0, 0, 1, 1], [], []>} : vector<2x16xf32>, vector<16x32xf32>, vector<2x32xf32> -> vector<2x32xf32>
    %4 = vector.broadcast %1 : vector<1x32xf32> to vector<2x32xf32>
    %5 = arith.addf %3, %4 : vector<2x32xf32>
    %c0_5 = arith.constant 0 : index
    %c0_6 = arith.constant 0 : index
    %6 = vector.load %arg5[%c0_5, %c0_6] : memref<1x32xf32, #tpu.memory_space<vmem>>, vector<1x32xf32>
    %cst_7 = arith.constant 0.000000e+00 : f32
    %7 = vector.broadcast %cst_7 : f32 to vector<2x32xf32>
    %8 = arith.maximumf %5, %7 : vector<2x32xf32>
    %c0_8 = arith.constant 0 : index
    %c0_9 = arith.constant 0 : index
    %9 = vector.load %arg4[%c0_8, %c0_9] : memref<32x32xf32, #tpu.memory_space<vmem>>, vector<32x32xf32>
    %cst_10 = arith.constant dense<0.000000e+00> : vector<2x32xf32>
    %10 = tpu.matmul %8, %9, %cst_10 {dimension_numbers = #tpu.dot_dimension_numbers<[1], [0], [0], [1], [0, 0, 1, 1], [], []>} : vector<2x32xf32>, vector<32x32xf32>, vector<2x32xf32> -> vector<2x32xf32>
    %11 = vector.broadcast %6 : vector<1x32xf32> to vector<2x32xf32>
    %12 = arith.addf %10, %11 : vector<2x32xf32>
    %c0_11 = arith.constant 0 : index
    %c0_12 = arith.constant 0 : index
    %13 = vector.load %arg7[%c0_11, %c0_12] : memref<1x8xf32, #tpu.memory_space<vmem>>, vector<1x8xf32>
    %cst_13 = arith.constant 0.000000e+00 : f32
    %14 = vector.broadcast %cst_13 : f32 to vector<2x32xf32>
    %15 = arith.maximumf %12, %14 : vector<2x32xf32>
    %c0_14 = arith.constant 0 : index
    %c0_15 = arith.constant 0 : index
    %16 = vector.load %arg6[%c0_14, %c0_15] : memref<32x8xf32, #tpu.memory_space<vmem>>, vector<32x8xf32>
    %cst_16 = arith.constant dense<0.000000e+00> : vector<2x8xf32>
    %17 = tpu.matmul %15, %16, %cst_16 {dimension_numbers = #tpu.dot_dimension_numbers<[1], [0], [0], [1], [0, 0, 1, 1], [], []>} : vector<2x32xf32>, vector<32x8xf32>, vector<2x8xf32> -> vector<2x8xf32>
    %18 = vector.broadcast %13 : vector<1x8xf32> to vector<2x8xf32>
    %19 = arith.addf %17, %18 : vector<2x8xf32>
    %c0_17 = arith.constant 0 : index
    %c0_18 = arith.constant 0 : index
    %20 = vector.load %arg8[%c0_17, %c0_18] : memref<2x8xf32, #tpu.memory_space<vmem>>, vector<2x8xf32>
    tpu.vector_store %arg8[%c0_17, %c0_18], %19 {strides = array<i32>} : memref<2x8xf32, #tpu.memory_space<vmem>>, vector<2x8xf32>,
    return
  }
  func.func @transform_0(%arg0: i32) -> (i32, i32) {
    %c0_i32 = arith.constant 0 : i32
    %c0_i32_0 = arith.constant 0 : i32
    return %arg0, %c0_i32 : i32, i32
  }
  func.func @transform_1(%arg0: i32) -> (i32, i32) {
    %c0_i32 = arith.constant 0 : i32
    %c0_i32_0 = arith.constant 0 : i32
    %c0_i32_1 = arith.constant 0 : i32
    return %c0_i32, %c0_i32_0 : i32, i32
  }
  func.func @transform_2(%arg0: i32) -> (i32, i32) {
    %c0_i32 = arith.constant 0 : i32
    %c0_i32_0 = arith.constant 0 : i32
    %c0_i32_1 = arith.constant 0 : i32
    return %c0_i32, %c0_i32_0 : i32, i32
  }
  func.func @transform_3(%arg0: i32) -> (i32, i32) {
    %c0_i32 = arith.constant 0 : i32
    %c0_i32_0 = arith.constant 0 : i32
    %c0_i32_1 = arith.constant 0 : i32
    return %c0_i32, %c0_i32_0 : i32, i32
  }
  func.func @transform_4(%arg0: i32) -> (i32, i32) {
    %c0_i32 = arith.constant 0 : i32
    %c0_i32_0 = arith.constant 0 : i32
    %c0_i32_1 = arith.constant 0 : i32
    return %c0_i32, %c0_i32_0 : i32, i32
  }
  func.func @transform_5(%arg0: i32) -> (i32, i32) {
    %c0_i32 = arith.constant 0 : i32
    %c0_i32_0 = arith.constant 0 : i32
    %c0_i32_1 = arith.constant 0 : i32
    return %c0_i32, %c0_i32_0 : i32, i32
  }
  func.func @transform_6(%arg0: i32) -> (i32, i32) {
    %c0_i32 = arith.constant 0 : i32
    %c0_i32_0 = arith.constant 0 : i32
    %c0_i32_1 = arith.constant 0 : i32
    return %c0_i32, %c0_i32_0 : i32, i32
  }
  func.func @transform_7(%arg0: i32) -> (i32, i32) {
    %c0_i32 = arith.constant 0 : i32
    %c0_i32_0 = arith.constant 0 : i32
    return %arg0, %c0_i32 : i32, i32
  }
}

</mosaic_0001>

<bundles_post_ra>
// kernel: tpu_custom_call.1
= control target key start
LH: loop header
LB: loop body
LE: loop exit
PB: predicated region body
PF: predicated region fallthrough
CT: control target
= control target key end

     0   :  { %12 = vsyncpa [#allocation3], 0  ;;  %s306_s0 = inlined_call_operand.vmem [shape: f32[2,16], index: 0, kind: input, shape index: {}]   ;;  %s307_s1 = inlined_call_operand.hbm [shape: f32[16,32], index: 1, kind: input, shape index: {}]   ;;  %s308_s2 = inlined_call_operand.vmem [shape: f32[1,32], index: 2, kind: input, shape index: {}]   ;;  %s309_s3 = inlined_call_operand.vmem [shape: f32[32,32], index: 3, kind: input, shape index: {}]   ;;  %s310_s4 = inlined_call_operand.vmem [shape: f32[1,32], index: 4, kind: input, shape index: {}]   ;;  %s311_s5 = inlined_call_operand.vmem [shape: f32[32,8], index: 5, kind: input, shape index: {}]   ;;  %s312_s6 = inlined_call_operand.vmem [shape: f32[1,8], index: 6, kind: input, shape index: {}]   ;;  %s313_s7 = inlined_call_operand.hbm [shape: f32[2,8], index: 7, kind: output, shape index: {}]  }
   0x1   :  { %13 = vsyncpa [#allocation4], 0  ;;  %s20_s26 = sshll.u32 %s307_s1, 4  ;;  %s220_s27 = smov [#allocation2]   ;;  %s21_s26 = int_to_ptr.hbm [resolvable:$true] %s20_s26 }
   0x2   :  { %s22_s28 = sshll.u32 %s220_s27, 4  ;;  %s221_s29 = smov 128   ;;  %s23_s28 = int_to_ptr.vmem [resolvable:$true] %s22_s28 }
   0x3   :  { %s222_s30 = smov 8  }
   0x4   :  { %28 = dma.hbm_to_vmem [thread:$0]  %s21_s26, 256, %s23_s28, [#allocation3], %s221_s29, %s221_s29, %s222_s30  }
   0x5   :  { %216 = dma.done.wait [#allocation3], 256  }
   0x6   :  { %217 = vsyncadd [#allocation3], 4294967040  ;;  %v46_v0 = vld [vmem:[#allocation2 + $0x8] sm:$0xff]  ;;  %v45_v1 = vld [vmem:[#allocation2] sm:$0xff]  ;;  %vm50_vm0 = vcmask 130048   ;;  %vm83_vm1 = vcmask 261120  }
   0x7   :  { %68 = vmatpush.msra.mxu0 %v46_v0  ;;  %v43_v2 = vld [vmem:[%s306_s0] sm:$0x3]  ;;  %v79_v3 = vld [vmem:[%s309_s3 + $0x18] sm:$0xff]  ;;  %v78_v4 = vld [vmem:[%s309_s3 + $0x10] sm:$0xff]  ;;  %s223_s28 = smov [#allocation5]   ;;  %s148_s9 = sshll.u32 %s313_s7, 4  ;;  %s149_s9 = int_to_ptr.hbm [resolvable:$true] %s148_s9 }
   0x8   :  { %99 = vmatpush.msra.mxu1 %v79_v3  ;;  %v77_v5 = vld [vmem:[%s309_s3 + $0x8] sm:$0xff]  ;;  %v76_v6 = vld [vmem:[%s309_s3] sm:$0xff]  ;;  %v112_v7 = vld [vmem:[%s311_s5 + $0x18] sm:$0xff]  ;;  %s146_s29 = sshll.u32 %s223_s28, 4  ;;  %vm139_vm2 = vcmask 58368   ;;  %s147_s29 = int_to_ptr.vmem [resolvable:$true] %s146_s29 }
   0x9   :  { %69 = vmatpush.msra.mxu0 %v45_v1  ;;  %131 = vmatpush.msra.mxu2 %v112_v7  ;;  %v165_v8 = vld [vmem:[%s308_s2] ss:$0 sm:$0xff]  ;;  %v111_v12 = vld [vmem:[%s311_s5 + $0x10] sm:$0xff]  ;;  %v110_v13 = vld [vmem:[%s311_s5 + $0x8] sm:$0xff] }
   0xa   :  { %158 = vmatmul.msk.f32.vlgmr.msra.gmra.mxu0 %vm50_vm0, %v43_v2  ;;  %100 = vmatpush.msra.mxu1 %v78_v4  ;;  %v109_v14 = vld [vmem:[%s311_s5] sm:$0xff] }
   0xb   :  { %132 = vmatpush.msra.mxu2 %v111_v12  ;;  %v166_v15 = vld [vmem:[%s310_s4] ss:$0 sm:$0xff] }
   0xc   :  { %101 = vmatpush.msra.mxu1 %v77_v5  ;;  %v167_v19 = vld [vmem:[%s312_s6] ss:$0 sm:$0xff] }
   0xd   :  { %133 = vmatpush.msra.mxu2 %v110_v13 }
   0xe   :  { %102 = vmatpush.msra.mxu1 %v76_v6 }
   0xf   :  { %134 = vmatpush.msra.mxu2 %v109_v14 }
  0x87   :  { %v71_v9 = vpop.f32.mrf.mxu0 }
  0x88   :  { %v72_v10 = vadd.f32 %v165_v8, %v71_v9 }
  0x8a   :  { %v75_v11 = vmax.f32 %v72_v10, 0.0 }
  0x8c   :  { %159 = vmatmul.msk.f32.vlgmr.msra.gmra.mxu1 %vm83_vm1, %v75_v11 }
 0x109   :  { %v104_v16 = vpop.f32.mrf.mxu1 }
 0x10a   :  { %v105_v17 = vadd.f32 %v166_v15, %v104_v16 }
 0x10c   :  { %v108_v18 = vmax.f32 %v105_v17, 0.0 }
 0x10e   :  { %160 = vmatmul.msk.f32.vlgmr.msra.gmra.mxu2 %vm83_vm1, %v108_v18 }
 0x191   :  { %v136_v20 = vpop.f32.mrf.mxu2 }
 0x192   :  { %v137_v21 = vadd.f32 %v167_v19, %v136_v20 }
 0x194   :  { %140 = vst.msk [vmem:[#allocation5] sm:$0x3] %vm139_vm2, %v137_v21 }
 0x195   :  { %151 = dma.vmem_to_hbm [thread:$0]  %s147_s29, 32, %s149_s9, [#allocation4]  }
 0x196   :  { %218 = dma.done.wait [#allocation4], 32  }
 0x197   :  { %219 = vsyncadd [#allocation4], 4294967264 }
 0x198   :  { %156 = vsyncpa [#allocation3], 1 }
 0x199   :  { %157 = vsyncpa [#allocation4], 1 }

</bundles_post_ra>
